<compile_context>
chip_gen: v7x
topology: tpu7x:2x2x1
jax: 0.10.0
libtpu: 0.0.40
codegen_flags: <defaults>
</compile_context>

<pallas_src>
import jax
import jax.numpy as jnp
from jax import lax
from jax.experimental import pallas as pl
from jax.experimental.pallas import tpu as pltpu

HIDDEN = 128
IN_FEATURES = 4
NUM_CLASSES = 2
CHUNK = 256          # lanes per fused inner chunk (2 lane groups)


def policy_kernel(xt_ref, w1_ref, b1_ref, w2dt_ref, b2d_ref, out_ref):
    # xt_ref  : [4, TB]    features x batch (batch on the lane axis)
    # w1_ref  : [128, 4]   nn.Linear(4, 128).weight (VMEM-resident across tiles)
    # b1_ref  : [128, 1]
    # w2dt_ref: [1, 128]   w2[0, :] - w2[1, :]   (MXU row operand)
    # b2d_ref : [1, 1]     b2[0] - b2[1]
    # out_ref : [2, TB]    class-major probabilities
    tb = out_ref.shape[1]
    chunk = CHUNK if tb % CHUNK == 0 else 128
    n_chunks = tb // chunk

    w1 = w1_ref[...]
    w2dt = w2dt_ref[...]

    # Hoisted chunk-invariant broadcasts (JAX does not CSE broadcast_in_dim).
    b1b = jnp.broadcast_to(b1_ref[...], (HIDDEN, chunk))          # [128, chunk]
    b2db = jnp.broadcast_to(b2d_ref[...], (1, chunk))             # [1,   chunk]
    w1b = [jnp.broadcast_to(w1[:, k:k + 1], (HIDDEN, chunk))      # lane-bcast once
           for k in range(IN_FEATURES)]
    # Row 0 -> +1, row 1 -> -1: probs = 0.5 + sign * t, single unmasked store.
    sign = jnp.where(
        lax.broadcasted_iota(jnp.int32, (NUM_CLASSES, chunk), 0) == 0, 1.0, -1.0)

    # Statically unrolled chunk loop (constant lane offsets). Fusing the reduce
    # and store per chunk keeps the live set ~32 vregs instead of [128, TB].
    for c in range(n_chunks):
        s = c * chunk
        xc = xt_ref[:, s:s + chunk]                               # [4, chunk]

        # Layer 1: unrolled K=4 broadcast-FMA on the VPU, bias folded into init.
        h = b1b
        for k in range(IN_FEATURES):
            h = h + w1b[k] * xc[k:k + 1, :]
        h = jnp.maximum(h, 0.0)                                   # ReLU [128, chunk]

        # Layer 2: 128-deep contraction with the class-difference vector on the
        # MXU (vex slot otherwise idle). HIGHEST keeps f32 accuracy for the
        # 1e-5 comparison against the f32 reference.
        d = lax.dot_general(
            w2dt, h, (((1,), (0,)), ((), ())),
            preferred_element_type=jnp.float32,
            precision=lax.Precision.HIGHEST) + b2db               # [1, chunk]

        # 2-class softmax == sigmoid(logit difference); EUP tanh form, no VPU
        # divide, and the two rows sum to exactly 1.0.
        # TODO(synk): for REINFORCE log-prob gradients compute the small tail
        # probability as exp-based sigmoid(-|d|) to keep relative precision.
        t = 0.5 * jnp.tanh(0.5 * d)                               # [1, chunk]
        out_ref[:, s:s + chunk] = 0.5 + sign * t                  # [2, chunk], one store


def _pick_tiling(B, tb):
    """Pick (tile width TB, padded batch Bp): lane-aligned, chunk-aligned tiles,
    and an even tile count when multi-tile (v7x megacore balance)."""
    tb = max(256, (tb // 256) * 256)
    b128 = pl.cdiv(B, 128) * 128
    if b128 <= tb:
        return b128, b128                       # single tile
    n = pl.cdiv(b128, tb)
    n += n % 2                                  # even number of grid steps
    TB = pl.cdiv(b128, n * 256) * 256           # multiple of the 256-lane chunk
    return TB, TB * n


def policy_forward(x, w1, b1, w2, b2, *, tb=2048):
    """x: [B, 4] f32; params in PyTorch layout (w1 [128,4], b1 [128], w2 [2,128],
    b2 [2]).  Returns probs [B, 2] f32."""
    B = x.shape[0]
    TB, Bp = _pick_tiling(B, tb)

    # TODO(synk): keep rollout buffers feature-major ([4, B]) upstream so this
    # transpose+pad and the final slice+transpose disappear; at per-env-step
    # batch sizes these wrapper XLA ops cost more than the kernel itself.
    xt = jnp.pad(x.astype(jnp.float32).T, ((0, 0), (0, Bp - B)))       # [4, Bp]
    b1c = b1.astype(jnp.float32).reshape(HIDDEN, 1)
    w2dt = (w2[0, :] - w2[1, :]).astype(jnp.float32).reshape(1, HIDDEN)
    b2d = (b2[0] - b2[1]).astype(jnp.float32).reshape(1, 1)

    out = pl.pallas_call(
        policy_kernel,
        out_shape=jax.ShapeDtypeStruct((NUM_CLASSES, Bp), jnp.float32),
        grid=(Bp // TB,),
        in_specs=[
            pl.BlockSpec((IN_FEATURES, TB), lambda i: (0, i)),       # x tile (streamed)
            pl.BlockSpec((HIDDEN, IN_FEATURES), lambda i: (0, 0)),   # w1   (resident)
            pl.BlockSpec((HIDDEN, 1), lambda i: (0, 0)),             # b1   (resident)
            pl.BlockSpec((1, HIDDEN), lambda i: (0, 0)),             # w2dt (resident)
            pl.BlockSpec((1, 1), lambda i: (0, 0)),                  # b2d  (resident)
        ],
        out_specs=pl.BlockSpec((NUM_CLASSES, TB), lambda i: (0, i)),
        compiler_params=pltpu.CompilerParams(
            dimension_semantics=("parallel",)),
    )(xt, w1.astype(jnp.float32), b1c, w2dt, b2d)

    return out[:, :B].T                                              # [B, 2]


def init_params(key):
    """PyTorch Linear default init: U(-1/sqrt(fan_in), +1/sqrt(fan_in))."""
    k1, k2, k3, k4 = jax.random.split(key, 4)
    bound1 = 1.0 / jnp.sqrt(4.0)
    bound2 = 1.0 / jnp.sqrt(128.0)
    w1 = jax.random.uniform(k1, (HIDDEN, IN_FEATURES), jnp.float32, -bound1, bound1)
    b1 = jax.random.uniform(k2, (HIDDEN,), jnp.float32, -bound1, bound1)
    w2 = jax.random.uniform(k3, (NUM_CLASSES, HIDDEN), jnp.float32, -bound2, bound2)
    b2 = jax.random.uniform(k4, (NUM_CLASSES,), jnp.float32, -bound2, bound2)
    return w1, b1, w2, b2


def reference_forward(x, w1, b1, w2, b2):
    h = jnp.maximum(x @ w1.T + b1, 0.0)
    s = h @ w2.T + b2
    return jax.nn.softmax(s, axis=1)


if __name__ == "__main__":
    key = jax.random.PRNGKey(0)
    kx, kp = jax.random.split(key)
    w1, b1, w2, b2 = init_params(kp)

    # Small per-step batch (CartPole state = 4 dims), as in the PyTorch script.
    x_small = jax.random.normal(kx, (2, IN_FEATURES), jnp.float32)
    probs_small = policy_forward(x_small, w1, b1, w2, b2)
    jax.block_until_ready(probs_small)
    ref_small = reference_forward(x_small, w1, b1, w2, b2)
    assert probs_small.shape == (2, 2)
    assert jnp.allclose(jnp.sum(probs_small, axis=1), 1.0, atol=1e-5)
    assert jnp.allclose(probs_small, ref_small, atol=1e-5), (probs_small, ref_small)

    # Batched rollout: multi-tile parallel grid (even tile count) + padding path.
    x_big = jax.random.normal(kx, (3000, IN_FEATURES), jnp.float32)
    probs_big = policy_forward(x_big, w1, b1, w2, b2)
    jax.block_until_ready(probs_big)
    ref_big = reference_forward(x_big, w1, b1, w2, b2)
    assert probs_big.shape == (3000, 2)
    assert jnp.allclose(jnp.sum(probs_big, axis=1), 1.0, atol=1e-5)
    assert jnp.allclose(probs_big, ref_big, atol=1e-5)

    print("KERNEL_OK")
</pallas_src>

<mosaic_0001>
module attributes {stable_mosaic.version = 11 : i64} {
  func.func @policy_kernel(%arg0: i32, %arg1: memref<4x128xf32, #tpu.memory_space<vmem>>, %arg2: memref<128x4xf32, #tpu.memory_space<vmem>>, %arg3: memref<128x1xf32, #tpu.memory_space<vmem>>, %arg4: memref<1x128xf32, #tpu.memory_space<vmem>>, %arg5: memref<1x1xf32, #tpu.memory_space<vmem>>, %arg6: memref<2x128xf32, #tpu.memory_space<vmem>>) attributes {dimension_semantics = [#tpu.dimension_semantics<parallel>], iteration_bounds = array<i64: 1>, scalar_prefetch = 0 : i64, scratch_operands = 0 : i64, tpu.core_type = #tpu.core_type<tc>, window_params = [{transform_indices = @transform_0, window_bounds = array<i64: 4, 128>}, {pipeline_mode = #tpu.pipeline_mode<synchronous>, transform_indices = @transform_1, window_bounds = array<i64: 128, 4>}, {pipeline_mode = #tpu.pipeline_mode<synchronous>, transform_indices = @transform_2, window_bounds = array<i64: 128, 1>}, {pipeline_mode = #tpu.pipeline_mode<synchronous>, transform_indices = @transform_3, window_bounds = array<i64: 1, 128>}, {pipeline_mode = #tpu.pipeline_mode<synchronous>, transform_indices = @transform_4, window_bounds = array<i64: 1, 1>}, {transform_indices = @transform_5, window_bounds = array<i64: 2, 128>}]} {
    %c0 = arith.constant 0 : index
    %c0_0 = arith.constant 0 : index
    %0 = vector.load %arg2[%c0, %c0_0] : memref<128x4xf32, #tpu.memory_space<vmem>>, vector<128x4xf32>
    %c0_1 = arith.constant 0 : index
    %c0_2 = arith.constant 0 : index
    %1 = vector.load %arg4[%c0_1, %c0_2] : memref<1x128xf32, #tpu.memory_space<vmem>>, vector<1x128xf32>
    %c0_3 = arith.constant 0 : index
    %c0_4 = arith.constant 0 : index
    %2 = vector.load %arg3[%c0_3, %c0_4] : memref<128x1xf32, #tpu.memory_space<vmem>>, vector<128x1xf32>
    %3 = vector.shape_cast %2 : vector<128x1xf32> to vector<128x1xf32>
    %4 = vector.broadcast %3 : vector<128x1xf32> to vector<128x128xf32>
    %c0_5 = arith.constant 0 : index
    %c0_6 = arith.constant 0 : index
    %5 = vector.load %arg5[%c0_5, %c0_6] : memref<1x1xf32, #tpu.memory_space<vmem>>, vector<1x1xf32>
    %6 = vector.shape_cast %5 : vector<1x1xf32> to vector<1x1xf32>
    %7 = vector.broadcast %6 : vector<1x1xf32> to vector<1x128xf32>
    %8 = vector.extract_strided_slice %0 {offsets = [0, 0], sizes = [128, 1], strides = [1, 1]} : vector<128x4xf32> to vector<128x1xf32>
    %9 = vector.shape_cast %8 : vector<128x1xf32> to vector<128x1xf32>
    %10 = vector.broadcast %9 : vector<128x1xf32> to vector<128x128xf32>
    %11 = vector.extract_strided_slice %0 {offsets = [0, 1], sizes = [128, 1], strides = [1, 1]} : vector<128x4xf32> to vector<128x1xf32>
    %12 = vector.shape_cast %11 : vector<128x1xf32> to vector<128x1xf32>
    %13 = vector.broadcast %12 : vector<128x1xf32> to vector<128x128xf32>
    %14 = vector.extract_strided_slice %0 {offsets = [0, 2], sizes = [128, 1], strides = [1, 1]} : vector<128x4xf32> to vector<128x1xf32>
    %15 = vector.shape_cast %14 : vector<128x1xf32> to vector<128x1xf32>
    %16 = vector.broadcast %15 : vector<128x1xf32> to vector<128x128xf32>
    %17 = vector.extract_strided_slice %0 {offsets = [0, 3], sizes = [128, 1], strides = [1, 1]} : vector<128x4xf32> to vector<128x1xf32>
    %18 = vector.shape_cast %17 : vector<128x1xf32> to vector<128x1xf32>
    %19 = vector.broadcast %18 : vector<128x1xf32> to vector<128x128xf32>
    %20 = tpu.iota {dimensions = array<i32: 0>} : vector<2x128xi32>
    %c0_i32 = arith.constant 0 : i32
    %21 = vector.broadcast %c0_i32 : i32 to vector<2x128xi32>
    %22 = arith.cmpi eq, %20, %21 : vector<2x128xi32>
    %cst = arith.constant 1.000000e+00 : f32
    %cst_7 = arith.constant -1.000000e+00 : f32
    %23 = vector.broadcast %cst : f32 to vector<2x128xf32>
    %24 = vector.broadcast %cst_7 : f32 to vector<2x128xf32>
    %25 = arith.select %22, %23, %24 : vector<2x128xi1>, vector<2x128xf32>
    %c0_8 = arith.constant 0 : index
    %c0_9 = arith.constant 0 : index
    %26 = vector.load %arg1[%c0_8, %c0_9] : memref<4x128xf32, #tpu.memory_space<vmem>>, vector<4x128xf32>
    %27 = vector.extract_strided_slice %26 {offsets = [0, 0], sizes = [1, 128], strides = [1, 1]} : vector<4x128xf32> to vector<1x128xf32>
    %28 = vector.broadcast %27 : vector<1x128xf32> to vector<128x128xf32>
    %29 = arith.mulf %10, %28 : vector<128x128xf32>
    %30 = arith.addf %4, %29 : vector<128x128xf32>
    %31 = vector.extract_strided_slice %26 {offsets = [1, 0], sizes = [1, 128], strides = [1, 1]} : vector<4x128xf32> to vector<1x128xf32>
    %32 = vector.broadcast %31 : vector<1x128xf32> to vector<128x128xf32>
    %33 = arith.mulf %13, %32 : vector<128x128xf32>
    %34 = arith.addf %30, %33 : vector<128x128xf32>
    %35 = vector.extract_strided_slice %26 {offsets = [2, 0], sizes = [1, 128], strides = [1, 1]} : vector<4x128xf32> to vector<1x128xf32>
    %36 = vector.broadcast %35 : vector<1x128xf32> to vector<128x128xf32>
    %37 = arith.mulf %16, %36 : vector<128x128xf32>
    %38 = arith.addf %34, %37 : vector<128x128xf32>
    %39 = vector.extract_strided_slice %26 {offsets = [3, 0], sizes = [1, 128], strides = [1, 1]} : vector<4x128xf32> to vector<1x128xf32>
    %40 = vector.broadcast %39 : vector<1x128xf32> to vector<128x128xf32>
    %41 = arith.mulf %19, %40 : vector<128x128xf32>
    %42 = arith.addf %38, %41 : vector<128x128xf32>
    %cst_10 = arith.constant 0.000000e+00 : f32
    %43 = vector.broadcast %cst_10 : f32 to vector<128x128xf32>
    %44 = arith.maximumf %42, %43 : vector<128x128xf32>
    %cst_11 = arith.constant dense<0.000000e+00> : vector<1x128xf32>
    %45 = tpu.matmul %1, %44, %cst_11 {dimension_numbers = #tpu.dot_dimension_numbers<[1], [0], [0], [1], [0, 0, 1, 1], [], []>, precision = #tpu.contract_precision<fp32>} : vector<1x128xf32>, vector<128x128xf32>, vector<1x128xf32> -> vector<1x128xf32>
    %46 = arith.addf %45, %7 : vector<1x128xf32>
    %cst_12 = arith.constant 5.000000e-01 : f32
    %47 = vector.broadcast %cst_12 : f32 to vector<1x128xf32>
    %48 = arith.mulf %47, %46 : vector<1x128xf32>
    %49 = math.tanh %48 : vector<1x128xf32>
    %cst_13 = arith.constant 5.000000e-01 : f32
    %50 = vector.broadcast %cst_13 : f32 to vector<1x128xf32>
    %51 = arith.mulf %50, %49 : vector<1x128xf32>
    %52 = vector.broadcast %51 : vector<1x128xf32> to vector<2x128xf32>
    %53 = arith.mulf %25, %52 : vector<2x128xf32>
    %cst_14 = arith.constant 5.000000e-01 : f32
    %54 = vector.broadcast %cst_14 : f32 to vector<2x128xf32>
    %55 = arith.addf %54, %53 : vector<2x128xf32>
    %c0_15 = arith.constant 0 : index
    %c0_16 = arith.constant 0 : index
    %56 = vector.load %arg6[%c0_15, %c0_16] : memref<2x128xf32, #tpu.memory_space<vmem>>, vector<2x128xf32>
    tpu.vector_store %arg6[%c0_15, %c0_16], %55 {strides = array<i32>} : memref<2x128xf32, #tpu.memory_space<vmem>>, vector<2x128xf32>,
    return
  }
  func.func @transform_0(%arg0: i32) -> (i32, i32) {
    %c0_i32 = arith.constant 0 : i32
    %c0_i32_0 = arith.constant 0 : i32
    return %c0_i32, %arg0 : i32, i32
  }
  func.func @transform_1(%arg0: i32) -> (i32, i32) {
    %c0_i32 = arith.constant 0 : i32
    %c0_i32_0 = arith.constant 0 : i32
    %c0_i32_1 = arith.constant 0 : i32
    return %c0_i32, %c0_i32_0 : i32, i32
  }
  func.func @transform_2(%arg0: i32) -> (i32, i32) {
    %c0_i32 = arith.constant 0 : i32
    %c0_i32_0 = arith.constant 0 : i32
    %c0_i32_1 = arith.constant 0 : i32
    return %c0_i32, %c0_i32_0 : i32, i32
  }
  func.func @transform_3(%arg0: i32) -> (i32, i32) {
    %c0_i32 = arith.constant 0 : i32
    %c0_i32_0 = arith.constant 0 : i32
    %c0_i32_1 = arith.constant 0 : i32
    return %c0_i32, %c0_i32_0 : i32, i32
  }
  func.func @transform_4(%arg0: i32) -> (i32, i32) {
    %c0_i32 = arith.constant 0 : i32
    %c0_i32_0 = arith.constant 0 : i32
    %c0_i32_1 = arith.constant 0 : i32
    return %c0_i32, %c0_i32_0 : i32, i32
  }
  func.func @transform_5(%arg0: i32) -> (i32, i32) {
    %c0_i32 = arith.constant 0 : i32
    %c0_i32_0 = arith.constant 0 : i32
    return %c0_i32, %arg0 : i32, i32
  }
}

</mosaic_0001>

<bundles_post_ra>
// kernel: tpu_custom_call.1
= control target key start
LH: loop header
LB: loop body
LE: loop exit
PB: predicated region body
PF: predicated region fallthrough
CT: control target
= control target key end

     0   :  { %s2489_s0 = inlined_call_operand.vmem [shape: f32[4,128], index: 0, kind: input, shape index: {}]   ;;  %s2490_s1 = inlined_call_operand.vmem [shape: f32[128,4], index: 1, kind: input, shape index: {}]   ;;  %s2491_s2 = inlined_call_operand.vmem [shape: f32[128,1], index: 2, kind: input, shape index: {}]   ;;  %s2492_s3 = inlined_call_operand.vmem [shape: f32[1,128], index: 3, kind: input, shape index: {}]   ;;  %s2493_s4 = inlined_call_operand.<no memory space> [shape: f32[1,1], index: 4, kind: input, shape index: {}]   ;;  %s2494_s5 = inlined_call_operand.hbm [shape: f32[2,128], index: 5, kind: output, shape index: {}]  }
   0x1   :  { %v10_v0 = vstv %s2493_s4 }
   0x2   :  { %11 = vst [vmem:[#allocation2] sm:$0x1] %v10_v0 }
   0x3   :  { %v40_v1 = vld [vmem:[%s2491_s2] sm:$0xff]  ;;  %v1842_v2 = vld [vmem:[%s2490_s1 + $0x10] sm:$0xff]  ;;  %v1794_v3 = vmov 2   ;;  %v1795_v4 = vmov 0   ;;  %v41_v5 = vld [vmem:[%s2491_s2 + $0x8] sm:$0xff] }
   0x4   :  { %1731 = vset.pattern.permute.xlu0 %v1794_v3  ;;  %1723 = vset.pattern.permute.xlu1 %v1795_v4  ;;  %v1853_v6 = vld [vmem:[%s2490_s1 + $0x30] sm:$0xff]  ;;  %v1864_v8 = vld [vmem:[%s2490_s1 + $0x8] sm:$0xff] }
   0x5   :  { %58 = vperm.xlu1 %1723, %v40_v1   ;;  %299 = vperm.xlu0 %1731, %v1842_v2   ;;  %v1859_v7 = vld [vmem:[%s2490_s1 + $0x50] sm:$0xff] }
   0x9   :  { %63 = vperm.xlu1 %1723, %v41_v5   ;;  %315 = vperm.xlu0 %1731, %v1853_v6  }
   0xa   :  { %12 = vsyncpa [#allocation4], 0  ;;  %v1796_v9 = vmov 1   ;;  %v23_v10 = vld [vmem:[%s2490_s1] sm:$0xff]  ;;  %v26_v11 = vld [vmem:[%s2490_s1 + $0x18] sm:$0xff]  ;;  %v1797_v17 = vmov 3   ;;  %v142_v59 = vlaneseq }
   0xb   :  { %v42_v12 = vld [vmem:[%s2491_s2 + $0x10] sm:$0xff]  ;;  %v43_v13 = vld [vmem:[%s2491_s2 + $0x18] sm:$0xff]  ;;  %v45_v14 = vld [vmem:[%s2491_s2 + $0x28] sm:$0xff]  ;;  %v1798_v29 = vmov 0.0|0.0   ;;  %vm1799_vm0 = vmmov 0  }
   0xc   :  { %v1894_v15 = vld [vmem:[%s2490_s1 + $0x38] sm:$0xff]  ;;  %v46_v16 = vld [vmem:[%s2491_s2 + $0x30] sm:$0xff]  ;;  %v49_v18 = vld [vmem:[%s2491_s2 + $0x48] sm:$0xff]  ;;  %1560 = vmatprep.subr.bf16.mxu1 %v1798_v29  ;;  %1632 = vmatprep.subr.bf16.mxu0 %v1798_v29  ;;  %v2052_v63 = vshrl.u32 %v142_v59, 7 }
   0xd   :  { %1724 = vset.pattern.permute.xlu1 %v1796_v9  ;;  %331 = vperm.xlu0 %1731, %v1859_v7   ;;  %v27_v19 = vld [vmem:[%s2490_s1 + $0x20] sm:$0xff]  ;;  %v1912_v20 = vld [vmem:[%s2490_s1 + $0x58] sm:$0xff]  ;;  %v28_v21 = vld [vmem:[%s2490_s1 + $0x28] sm:$0xff] }
   0xe   :  { %231 = vperm.xlu1 %1724, %v1864_v8   ;;  %v50_v22 = vld [vmem:[%s2491_s2 + $0x50] sm:$0xff]  ;;  %v53_v23 = vld [vmem:[%s2491_s2 + $0x68] sm:$0xff]  ;;  %v1928_v24 = vld [vmem:[%s2490_s1 + $0x78] sm:$0xff]  ;;  %v2058_v1 = vsub.s32 0, %v2052_v63  ;;  %vm420_vm1 = vcmp.eq.s32.totalorder %v2052_v63, 0 }
   0xf   :  { %v44_v25 = vld [vmem:[%s2491_s2 + $0x20] sm:$0xff]  ;;  %v54_v26 = vld [vmem:[%s2491_s2 + $0x70] sm:$0xff]  ;;  %v47_v28 = vld [vmem:[%s2491_s2 + $0x38] sm:$0xff] }
  0x10   :  { %v1949_v27 = vld [vmem:[%s2490_s1 + $0x70] sm:$0xff]  ;;  %v31_v30 = vld [vmem:[%s2490_s1 + $0x40] sm:$0xff]  ;;  %v32_v31 = vld [vmem:[%s2490_s1 + $0x48] sm:$0xff] }
  0x11   :  { %1752 = vset.pattern.permute.xlu0 %v1795_v4  ;;  %v1977_v32 = vld [vmem:[%s2490_s1 + $0x68] sm:$0xff]  ;;  %v48_v33 = vld [vmem:[%s2491_s2 + $0x40] sm:$0xff]  ;;  %v51_v45 = vld [vmem:[%s2491_s2 + $0x58] sm:$0xff] }
  0x12   :  { %1725 = vset.pattern.permute.xlu1 %v1795_v4  ;;  %148 = vperm.xlu0 %1752, %v23_v10   ;;  %v2032_v53 = vld [vmem:[%s2490_s1 + $0x60] sm:$0xff] }
  0x13   :  { %158 = vperm.xlu1 %1725, %v1842_v2   ;;  %v52_v61 = vld [vmem:[%s2491_s2 + $0x60] sm:$0xff] }
  0x16   :  { %153 = vperm.xlu0 %1752, %v1864_v8  }
  0x17   :  { %1726 = vset.pattern.permute.xlu1 %v1794_v3 }
  0x18   :  { %291 = vperm.xlu1 %1726, %v23_v10  }
  0x1a   :  { %163 = vperm.xlu0 %1752, %v26_v11  }
  0x1c   :  { %295 = vperm.xlu1 %1726, %v1864_v8  }
  0x1e   :  { %68 = vperm.xlu0 %1752, %v42_v12  }
  0x20   :  { %1727 = vset.pattern.permute.xlu1 %v1795_v4 }
  0x21   :  { %73 = vperm.xlu1 %1727, %v43_v13  }
  0x22   :  { %83 = vperm.xlu0 %1752, %v45_v14   ;;  %v533_v14 = vsub.s32 3, %v2052_v63 }
  0x25   :  { %1728 = vset.pattern.permute.xlu1 %v1796_v9 }
  0x26   :  { %183 = vperm.xlu0 %1752, %v1894_v15   ;;  %239 = vperm.xlu1 %1728, %v26_v11  }
  0x2a   :  { %88 = vperm.xlu0 %1752, %v46_v16   ;;  %1729 = vset.pattern.permute.xlu1 %v1797_v17 }
  0x2b   :  { %355 = vperm.xlu1 %1729, %v23_v10  }
  0x2e   :  { %103 = vperm.xlu0 %1752, %v49_v18  }
  0x2f   :  { %1730 = vset.pattern.permute.xlu1 %v1795_v4 }
  0x30   :  { %168 = vperm.xlu1 %1730, %v27_v19  }
  0x32   :  { %203 = vperm.xlu0 %1752, %v1912_v20  }
  0x34   :  { %173 = vperm.xlu1 %1730, %v28_v21  }
  0x36   :  { %108 = vperm.xlu0 %1752, %v50_v22  }
  0x38   :  { %1732 = vset.pattern.permute.xlu1 %v1794_v3 }
  0x39   :  { %303 = vperm.xlu1 %1732, %v26_v11  }
  0x3a   :  { %123 = vperm.xlu0 %1752, %v53_v23  }
  0x3d   :  { %1733 = vset.pattern.permute.xlu1 %v1795_v4 }
  0x3e   :  { %223 = vperm.xlu0 %1752, %v1928_v24   ;;  %78 = vperm.xlu1 %1733, %v44_v25  }
  0x42   :  { %128 = vperm.xlu0 %1752, %v54_v26   ;;  %1734 = vset.pattern.permute.xlu1 %v1796_v9 }
  0x43   :  { %243 = vperm.xlu1 %1734, %v27_v19  }
  0x46   :  { %1759 = vset.pattern.permute.xlu0 %v1796_v9 }
  0x47   :  { %227 = vperm.xlu0 %1759, %v23_v10   ;;  %247 = vperm.xlu1 %1734, %v28_v21   ;;  %v497_v10 = vsub.s32 2, %v2052_v63 }
  0x4b   :  { %235 = vperm.xlu0 %1759, %v1842_v2   ;;  %1735 = vset.pattern.permute.xlu1 %v1797_v17 }
  0x4c   :  { %367 = vperm.xlu1 %1735, %v26_v11  }
  0x4f   :  { %251 = vperm.xlu0 %1759, %v1853_v6  }
  0x50   :  { %1736 = vset.pattern.permute.xlu1 %v1795_v4 }
  0x51   :  { %178 = vperm.xlu1 %1736, %v1853_v6  }
  0x53   :  { %267 = vperm.xlu0 %1759, %v1859_v7  }
  0x55   :  { %1737 = vset.pattern.permute.xlu1 %v1794_v3 }
  0x56   :  { %307 = vperm.xlu1 %1737, %v27_v19  }
  0x57   :  { %283 = vperm.xlu0 %1759, %v1949_v27  }
  0x5a   :  { %311 = vperm.xlu1 %1737, %v28_v21  }
  0x5b   :  { %1761 = vset.pattern.permute.xlu0 %v1797_v17 }
  0x5c   :  { %359 = vperm.xlu0 %1761, %v1864_v8   ;;  %v461_v8 = vsub.s32 1, %v2052_v63 }
  0x5e   :  { %1738 = vset.pattern.permute.xlu1 %v1795_v4 }
  0x5f   :  { %93 = vperm.xlu1 %1738, %v47_v28  }
  0x60   :  { %363 = vperm.xlu0 %1761, %v1842_v2  }
  0x63   :  { %1739 = vset.pattern.permute.xlu1 %v1796_v9 }
  0x64   :  { %375 = vperm.xlu0 %1761, %v28_v21   ;;  %255 = vperm.xlu1 %1739, %v1894_v15  }
  0x68   :  { %379 = vperm.xlu0 %1761, %v1853_v6   ;;  %1740 = vset.pattern.permute.xlu1 %v1797_v17  ;;  %v422_v6 = vld [vmem:[%s2489_s0] sm:$0xf] }
  0x69   :  { %371 = vperm.xlu1 %1740, %v27_v19   ;;  %v2084_v18 = vrot.slane %v422_v6, %v497_v10  ;;  %v2088_v25 = vrot.slane %v422_v6, %v533_v14 }
  0x6c   :  { %391 = vperm.xlu0 %1761, %v32_v31  }
  0x6d   :  { %1741 = vset.pattern.permute.xlu1 %v1795_v4 }
  0x6e   :  { %188 = vperm.xlu1 %1741, %v31_v30  }
  0x70   :  { %395 = vperm.xlu0 %1761, %v1859_v7  }
  0x72   :  { %193 = vperm.xlu1 %1741, %v32_v31  }
  0x74   :  { %407 = vperm.xlu0 %1761, %v1977_v32  }
  0x76   :  { %1742 = vset.pattern.permute.xlu1 %v1794_v3 }
  0x77   :  { %319 = vperm.xlu1 %1742, %v1894_v15  }
  0x78   :  { %411 = vperm.xlu0 %1761, %v1949_v27  }
  0x7b   :  { %1743 = vset.pattern.permute.xlu1 %v1795_v4 }
  0x7c   :  { %98 = vperm.xlu1 %1743, %v48_v33   ;;  %1766 = vset.pattern.permute.xlu0 %v1795_v4 }
  0x80   :  { %1744 = vset.pattern.permute.xlu1 %v1796_v9 }
  0x81   :  { %259 = vperm.xlu1 %1744, %v31_v30  }
  0x84   :  { %v1989_v34 = vpop.permute.xlu1 %58  ;;  %v1991_v35 = vpop.permute.xlu0 %299 }
  0x85   :  { %263 = vperm.xlu1 %1744, %v32_v31  }
  0x88   :  { %v1993_v36 = vpop.permute.xlu1 %63  ;;  %v1995_v37 = vpop.permute.xlu0 %315 }
  0x89   :  { %1745 = vset.pattern.permute.xlu1 %v1797_v17 }
  0x8a   :  { %383 = vperm.xlu1 %1745, %v1894_v15   ;;  %v2081_v15 = vrot.slane %v422_v6, %v461_v8 }
  0x8c   :  { %v1999_v38 = vpop.permute.xlu0 %331 }
  0x8d   :  { %v2001_v39 = vpop.permute.xlu1 %231 }
  0x8e   :  { %1746 = vset.pattern.permute.xlu1 %v1795_v4 }
  0x8f   :  { %198 = vperm.xlu1 %1746, %v1859_v7   ;;  %v2069_v7 = vrot.slane %v422_v6, %v2058_v1 }
  0x91   :  { %v149_v40 = vpop.permute.xlu0 %148 }
  0x92   :  { %v2005_v41 = vpop.permute.xlu1 %158  ;;  %v427_v13 = vmul.f32 %v2069_v7, %v149_v40 }
  0x93   :  { %1747 = vset.pattern.permute.xlu1 %v1794_v3 }
  0x94   :  { %323 = vperm.xlu1 %1747, %v31_v30   ;;  %v443_v23 = vadd.f32 %v427_v13, %v1989_v34 }
  0x95   :  { %v2008_v42 = vpop.permute.xlu0 %153 }
  0x96   :  { %v428_v14 = vmul.f32 %v2069_v7, %v2008_v42 }
  0x97   :  { %v2010_v43 = vpop.permute.xlu1 %291 }
  0x98   :  { %327 = vperm.xlu1 %1747, %v32_v31   ;;  %v499_v31 = vmul.f32 %v2084_v18, %v2010_v43  ;;  %v444_v42 = vadd.f32 %v428_v14, %v1993_v36  ;;  %v55_v36 = vld [vmem:[%s2491_s2 + $0x78] sm:$0xff] }
  0x99   :  { %v164_v44 = vpop.permute.xlu0 %163 }
  0x9a   :  { %v430_v16 = vmul.f32 %v2069_v7, %v164_v44 }
  0x9b   :  { %v2015_v46 = vpop.permute.xlu1 %295 }
  0x9c   :  { %1748 = vset.pattern.permute.xlu1 %v1795_v4 }
  0x9d   :  { %v2018_v47 = vpop.permute.xlu0 %68  ;;  %113 = vperm.xlu1 %1748, %v51_v45  }
  0xa0   :  { %v74_v48 = vpop.permute.xlu1 %73 }
  0xa1   :  { %1749 = vset.pattern.permute.xlu1 %v1796_v9  ;;  %v2021_v49 = vpop.permute.xlu0 %83  ;;  %v446_v28 = vadd.f32 %v430_v16, %v74_v48 }
  0xa2   :  { %271 = vperm.xlu1 %1749, %v1912_v20  }
  0xa5   :  { %v240_v50 = vpop.permute.xlu1 %239  ;;  %v2024_v51 = vpop.permute.xlu0 %183 }
  0xa6   :  { %1750 = vset.pattern.permute.xlu1 %v1797_v17  ;;  %v466_v19 = vmul.f32 %v2081_v15, %v240_v50 }
  0xa7   :  { %387 = vperm.xlu1 %1750, %v31_v30  }
  0xa8   :  { %v482_v40 = vadd.f32 %v466_v19, %v446_v28 }
  0xa9   :  { %v2027_v52 = vpop.permute.xlu0 %88 }
  0xaa   :  { %v356_v54 = vpop.permute.xlu1 %355 }
  0xab   :  { %1751 = vset.pattern.permute.xlu1 %v1795_v4  ;;  %v535_v45 = vmul.f32 %v2088_v25, %v356_v54 }
  0xac   :  { %208 = vperm.xlu1 %1751, %v2032_v53  }
  0xad   :  { %v2036_v55 = vpop.permute.xlu0 %103 }
  0xaf   :  { %v2038_v56 = vpop.permute.xlu1 %168 }
  0xb0   :  { %213 = vperm.xlu1 %1751, %v1977_v32  }
  0xb1   :  { %v2041_v57 = vpop.permute.xlu0 %203 }
  0xb3   :  { %v2043_v58 = vpop.permute.xlu1 %173 }
  0xb4   :  { %1753 = vset.pattern.permute.xlu1 %v1794_v3 }
  0xb5   :  { %335 = vperm.xlu1 %1753, %v1912_v20   ;;  %v2047_v60 = vpop.permute.xlu0 %108 }
  0xb8   :  { %v304_v62 = vpop.permute.xlu1 %303 }
  0xb9   :  { %1754 = vset.pattern.permute.xlu1 %v1795_v4  ;;  %v2055_v0 = vpop.permute.xlu0 %123  ;;  %v502_v30 = vmul.f32 %v2084_v18, %v304_v62 }
  0xba   :  { %118 = vperm.xlu1 %1754, %v52_v61  }
  0xbb   :  { %v518_v59 = vadd.f32 %v502_v30, %v482_v40 }
  0xbd   :  { %v2060_v2 = vpop.permute.xlu1 %78  ;;  %v2062_v5 = vpop.permute.xlu0 %223 }
  0xbe   :  { %1755 = vset.pattern.permute.xlu1 %v1796_v9 }
  0xbf   :  { %275 = vperm.xlu1 %1755, %v2032_v53  }
  0xc1   :  { %v2074_v11 = vpop.permute.xlu0 %128 }
  0xc2   :  { %v2076_v12 = vpop.permute.xlu1 %243 }
  0xc3   :  { %279 = vperm.xlu1 %1755, %v1977_v32  }
  0xc6   :  { %v228_v21 = vpop.permute.xlu0 %227  ;;  %v248_v22 = vpop.permute.xlu1 %247 }
  0xc7   :  { %v463_v26 = vmul.f32 %v2081_v15, %v228_v21  ;;  %1756 = vset.pattern.permute.xlu1 %v1797_v17  ;;  %v505_v21 = vmul.f32 %v2084_v18, %v1995_v37  ;;  %v464_v37 = vmul.f32 %v2081_v15, %v2001_v39  ;;  %v432_v39 = vmul.f32 %v2069_v7, %v2043_v58 }
  0xc8   :  { %399 = vperm.xlu1 %1756, %v1912_v20  }
  0xc9   :  { %v479_v33 = vadd.f32 %v463_v26, %v443_v23 }
  0xca   :  { %v236_v44 = vpop.permute.xlu0 %235 }
  0xcb   :  { %v515_v34 = vadd.f32 %v499_v31, %v479_v33  ;;  %v368_v50 = vpop.permute.xlu1 %367 }
  0xcc   :  { %v538_v61 = vmul.f32 %v2088_v25, %v368_v50  ;;  %1757 = vset.pattern.permute.xlu1 %v1795_v4  ;;  %v480_v50 = vadd.f32 %v464_v37, %v444_v42 }
  0xcd   :  { %v551_v48 = vadd.f32 %v535_v45, %v515_v34  ;;  %218 = vperm.xlu1 %1757, %v1949_v27   ;;  %v500_v45 = vmul.f32 %v2084_v18, %v2015_v46  ;;  %v465_v34 = vmul.f32 %v2081_v15, %v236_v44 }
  0xce   :  { %v554_v62 = vadd.f32 %v538_v61, %v518_v59  ;;  %v252_v20 = vpop.permute.xlu0 %251 }
  0xcf   :  { %v567_v6 = vmax.f32 %v551_v48, 0.0  ;;  %v469_v10 = vmul.f32 %v2081_v15, %v252_v20  ;;  %v516_v46 = vadd.f32 %v500_v45, %v480_v50 }
  0xd0   :  { %v570_v8 = vmax.f32 %v554_v62, 0.0  ;;  %v179_v43 = vpop.permute.xlu1 %178  ;;  %v468_v62 = vmul.f32 %v2081_v15, %v248_v22  ;;  %v467_v22 = vmul.f32 %v2081_v15, %v2076_v12 }
  0xd1   :  { %v433_v13 = vmul.f32 %v2069_v7, %v179_v43  ;;  %1758 = vset.pattern.permute.xlu1 %v1794_v3  ;;  %v584_v54 = vand.u32 4294901760, %v567_v6 }
  0xd2   :  { %v2105_v16 = vand.u32 4294901760, %v570_v8  ;;  %339 = vperm.xlu1 %1758, %v2032_v53   ;;  %v2108_v19 = vpop.permute.xlu0 %267 }
  0xd3   :  { %v449_v23 = vadd.f32 %v433_v13, %v2027_v52  ;;  %v2113_v26 = vsub.f32 %v567_v6, %v584_v54  ;;  %v429_v52 = vmul.f32 %v2069_v7, %v2005_v41  ;;  %v501_v41 = vmul.f32 %v2084_v18, %v1991_v35 }
  0xd4   :  { %v2116_v28 = vsub.f32 %v570_v8, %v2105_v16 }
  0xd5   :  { %v485_v30 = vadd.f32 %v469_v10, %v449_v23  ;;  %v308_v31 = vpop.permute.xlu1 %307  ;;  %v445_v59 = vadd.f32 %v429_v52, %v2018_v47  ;;  %v448_v47 = vadd.f32 %v432_v39, %v2021_v49  ;;  %v431_v10 = vmul.f32 %v2069_v7, %v2038_v56 }
  0xd6   :  { %343 = vperm.xlu1 %1758, %v1977_v32   ;;  %v2120_v33 = vpop.permute.xlu0 %283  ;;  %v677_v42 = vand.u32 4294901760, %v2113_v26  ;;  %v503_v12 = vmul.f32 %v2084_v18, %v308_v31 }
  0xd7   :  { %v2122_v40 = vadd.f32 %v505_v21, %v485_v30  ;;  %v481_v44 = vadd.f32 %v465_v34, %v445_v59  ;;  %v484_v13 = vadd.f32 %v468_v62, %v448_v47  ;;  %v447_v21 = vadd.f32 %v431_v10, %v2060_v2 }
  0xd9   :  { %v312_v32 = vpop.permute.xlu1 %311  ;;  %v517_v43 = vadd.f32 %v501_v41, %v481_v44  ;;  %v483_v34 = vadd.f32 %v467_v22, %v447_v21 }
  0xda   :  { %1760 = vset.pattern.permute.xlu1 %v1795_v4  ;;  %v504_v58 = vmul.f32 %v2084_v18, %v312_v32 }
  0xdb   :  { %v360_v61 = vpop.permute.xlu0 %359  ;;  %133 = vperm.xlu1 %1760, %v55_v36  }
  0xdc   :  { %v536_v48 = vmul.f32 %v2088_v25, %v360_v61  ;;  %v520_v37 = vadd.f32 %v504_v58, %v484_v13  ;;  %v678_v61 = vsub.f32 %v2113_v26, %v677_v42 }
  0xde   :  { %v552_v20 = vadd.f32 %v536_v48, %v516_v46  ;;  %v2142_v6 = vpop.permute.xlu1 %93  ;;  %v519_v48 = vadd.f32 %v503_v12, %v483_v34  ;;  %v679_v10 = vand.u32 4294901760, %v678_v61 }
  0xdf   :  { %v364_v4 = vpop.permute.xlu0 %363  ;;  %1762 = vset.pattern.permute.xlu1 %v1796_v9  ;;  %v698_v9 = vand.u32 4294901760, %v2116_v28 }
  0xe0   :  { %v568_v8 = vmax.f32 %v552_v20, 0.0  ;;  %v537_v35 = vmul.f32 %v2088_v25, %v364_v4  ;;  %287 = vperm.xlu1 %1762, %v1928_v24  }
  0xe1   :  { %v699_v59 = vsub.f32 %v2116_v28, %v698_v9 }
  0xe2   :  { %v587_v14 = vand.u32 4294901760, %v568_v8  ;;  %v553_v49 = vadd.f32 %v537_v35, %v517_v43 }
  0xe3   :  { %v376_v23 = vpop.permute.xlu0 %375  ;;  %v2155_v30 = vpop.permute.xlu1 %255 }
  0xe4   :  { %v2158_v52 = vsub.f32 %v568_v8, %v587_v14  ;;  %v569_v45 = vmax.f32 %v553_v49, 0.0  ;;  %v540_v56 = vmul.f32 %v2088_v25, %v376_v23  ;;  %1763 = vset.pattern.permute.xlu1 %v1797_v17  ;;  %v2164_v2 = vpack.c.bf16 %v587_v14, %v584_v54 }
  0xe5   :  { %403 = vperm.xlu1 %1763, %v2032_v53  }
  0xe6   :  { %v684_v36 = vand.u32 4294901760, %v2158_v52  ;;  %v590_v32 = vand.u32 4294901760, %v569_v45  ;;  %v556_v50 = vadd.f32 %v540_v56, %v520_v37  ;;  %1562 = vmatpush3.bf16.msra.mxu1 %v2164_v2  ;;  %1634 = vmatpush3.bf16.msra.mxu0 %v2164_v2 }
  0xe7   :  { %v380_v39 = vpop.permute.xlu0 %379  ;;  %1563 = vmatprep.subr.bf16.mxu1 %v1798_v29  ;;  %1635 = vmatprep.subr.bf16.mxu0 %v1798_v29 }
  0xe8   :  { %v685_v53 = vsub.f32 %v2158_v52, %v684_v36  ;;  %v2174_v54 = vsub.f32 %v569_v45, %v590_v32  ;;  %v572_v41 = vmax.f32 %v556_v50, 0.0  ;;  %v541_v46 = vmul.f32 %v2088_v25, %v380_v39  ;;  %v372_v44 = vpop.permute.xlu1 %371 }
  0xe9   :  { %v539_v62 = vmul.f32 %v2088_v25, %v372_v44  ;;  %1764 = vset.pattern.permute.xlu1 %v1794_v3  ;;  %v2182_v20 = vpack.c.bf16 %v2105_v16, %v590_v32  ;;  %v2184_v47 = vpack.c.bf16 %v684_v36, %v677_v42  ;;  %v700_v42 = vand.u32 4294901760, %v699_v59 }
  0xea   :  { %v691_v4 = vand.u32 4294901760, %v2174_v54  ;;  %v599_v58 = vand.u32 4294901760, %v572_v41  ;;  %v557_v8 = vadd.f32 %v541_v46, %v2122_v40  ;;  %347 = vperm.xlu1 %1764, %v1949_v27   ;;  %v686_v43 = vand.u32 4294901760, %v685_v53 }
  0xeb   :  { %v555_v35 = vadd.f32 %v539_v62, %v519_v48  ;;  %1565 = vmatpush3.bf16.msra.mxu1 %v2182_v20  ;;  %1637 = vmatpush3.bf16.msra.mxu0 %v2182_v20  ;;  %v1800_v62 = vmov 0.0  }
  0xec   :  { %v692_v16 = vsub.f32 %v2174_v54, %v691_v4  ;;  %v2194_v22 = vsub.f32 %v572_v41, %v599_v58  ;;  %v573_v13 = vmax.f32 %v557_v8, 0.0  ;;  %1566 = vmatprep.subr.bf16.mxu1 %v1798_v29  ;;  %1638 = vmatprep.subr.bf16.mxu0 %v1798_v29  ;;  %v2200_v14 = vpack.c.bf16 %v686_v43, %v679_v10 }
  0xed   :  { %v571_v27 = vmax.f32 %v555_v35, 0.0  ;;  %v2198_v40 = vpop.permute.xlu1 %188  ;;  %v2202_v49 = vpack.c.bf16 %v698_v9, %v691_v4  ;;  %1382 = vmatprep.mubr.msk.f32.mxu1 %vm1799_vm0, %v1800_v62  ;;  %1487 = vmatprep.mubr.msk.f32.mxu0 %vm1799_vm0, %v1800_v62  ;;  %v434_v4 = vmul.f32 %v2069_v7, %v2024_v51 }
  0xee   :  { %v602_v21 = vand.u32 4294901760, %v573_v13  ;;  %351 = vperm.xlu1 %1764, %v1928_v24   ;;  %v693_v23 = vand.u32 4294901760, %v692_v16  ;;  %v712_v37 = vand.u32 4294901760, %v2194_v22 }
  0xef   :  { %v596_v45 = vand.u32 4294901760, %v571_v27  ;;  %v450_v43 = vadd.f32 %v434_v4, %v2142_v6 }
  0xf0   :  { %v2206_v56 = vsub.f32 %v573_v13, %v602_v21  ;;  %v2208_v12 = vpack.c.bf16 %v700_v42, %v693_v23  ;;  %v713_v9 = vsub.f32 %v2194_v22, %v712_v37 }
  0xf1   :  { %v2210_v34 = vsub.f32 %v571_v27, %v596_v45  ;;  %v194_v36 = vpop.permute.xlu1 %193  ;;  %v2212_v32 = vpack.c.bf16 %v599_v58, %v596_v45  ;;  %v470_v58 = vmul.f32 %v2081_v15, %v2155_v30  ;;  %v473_v45 = vmul.f32 %v2081_v15, %v2108_v19 }
  0xf2   :  { %1765 = vset.pattern.permute.xlu1 %v1797_v17  ;;  %v714_v46 = vand.u32 4294901760, %v713_v9  ;;  %v719_v30 = vand.u32 4294901760, %v2206_v56 }
  0xf3   :  { %v705_v50 = vand.u32 4294901760, %v2210_v34  ;;  %415 = vperm.xlu1 %1765, %v1928_v24   ;;  %1568 = vmatpush3.bf16.msra.mxu1 %v2212_v32  ;;  %v486_v10 = vadd.f32 %v470_v58, %v450_v43 }
  0xf4   :  { %1640 = vmatpush3.bf16.msra.mxu0 %v2212_v32  ;;  %1569 = vmatprep.subr.bf16.mxu1 %v1798_v29  ;;  %v720_v19 = vsub.f32 %v2206_v56, %v719_v30 }
  0xf5   :  { %v706_v39 = vsub.f32 %v2210_v34, %v705_v50  ;;  %1641 = vmatprep.subr.bf16.mxu0 %v1798_v29  ;;  %v2225_v61 = vpack.c.bf16 %v712_v37, %v705_v50  ;;  %v436_v50 = vmul.f32 %v2069_v7, %v194_v36 }
  0xf6   :  { %v320_v53 = vpop.permute.xlu1 %319 }
  0xf7   :  { %v707_v41 = vand.u32 4294901760, %v706_v39  ;;  %v506_v35 = vmul.f32 %v2084_v18, %v320_v53 }
  0xf9   :  { %v2227_v44 = vpack.c.bf16 %v714_v46, %v707_v41  ;;  %v522_v13 = vadd.f32 %v506_v35, %v486_v10  ;;  %v509_v41 = vmul.f32 %v2084_v18, %v1999_v38  ;;  %v452_v38 = vadd.f32 %v436_v50, %v2036_v55  ;;  %v392_v35 = vpop.permute.xlu0 %391 }
  0xfa   :  { %v544_v10 = vmul.f32 %v2088_v25, %v392_v35  ;;  %v435_v50 = vmul.f32 %v2069_v7, %v2198_v40 }
  0xfb   :  { %v99_v24 = vpop.permute.xlu1 %98 }
 0x100   :  { %v260_v48 = vpop.permute.xlu1 %259 }
 0x104   :  { %v264_v8 = vpop.permute.xlu1 %263 }
 0x105   :  { %v472_v58 = vmul.f32 %v2081_v15, %v264_v8 }
 0x109   :  { %v384_v16 = vpop.permute.xlu1 %383 }
 0x10a   :  { %v542_v27 = vmul.f32 %v2088_v25, %v384_v16 }
 0x10c   :  { %v558_v23 = vadd.f32 %v542_v27, %v522_v13  ;;  %v488_v13 = vadd.f32 %v472_v58, %v452_v38  ;;  %v451_v58 = vadd.f32 %v435_v50, %v99_v24 }
 0x10e   :  { %v574_v42 = vmax.f32 %v558_v23, 0.0  ;;  %v199_v37 = vpop.permute.xlu1 %198  ;;  %v721_v23 = vand.u32 4294901760, %v720_v19 }
 0x10f   :  { %v437_v51 = vmul.f32 %v2069_v7, %v199_v37 }
 0x110   :  { %v605_v9 = vand.u32 4294901760, %v574_v42 }
 0x111   :  { %v453_v6 = vadd.f32 %v437_v51, %v2047_v60 }
 0x112   :  { %v2246_v39 = vsub.f32 %v574_v42, %v605_v9  ;;  %v2248_v53 = vpack.c.bf16 %v605_v9, %v602_v21 }
 0x113   :  { %v489_v46 = vadd.f32 %v473_v45, %v453_v6  ;;  %v324_v4 = vpop.permute.xlu1 %323 }
 0x114   :  { %v726_v43 = vand.u32 4294901760, %v2246_v39  ;;  %1571 = vmatpush3.bf16.msra.mxu1 %v2248_v53  ;;  %1643 = vmatpush3.bf16.msra.mxu0 %v2248_v53 }
 0x115   :  { %v525_v21 = vadd.f32 %v509_v41, %v489_v46  ;;  %1572 = vmatprep.subr.bf16.mxu1 %v1798_v29  ;;  %1644 = vmatprep.subr.bf16.mxu0 %v1798_v29 }
 0x116   :  { %v727_v36 = vsub.f32 %v2246_v39, %v726_v43  ;;  %v2263_v8 = vpack.c.bf16 %v726_v43, %v719_v30  ;;  %v471_v30 = vmul.f32 %v2081_v15, %v260_v48  ;;  %v507_v43 = vmul.f32 %v2084_v18, %v324_v4 }
 0x117   :  { %v328_v16 = vpop.permute.xlu1 %327 }
 0x118   :  { %v508_v27 = vmul.f32 %v2084_v18, %v328_v16  ;;  %v728_v42 = vand.u32 4294901760, %v727_v36  ;;  %v487_v19 = vadd.f32 %v471_v30, %v451_v58  ;;  %v396_v58 = vpop.permute.xlu0 %395 }
 0x11a   :  { %v524_v37 = vadd.f32 %v508_v27, %v488_v13  ;;  %v2267_v45 = vpack.c.bf16 %v728_v42, %v721_v23  ;;  %v523_v36 = vadd.f32 %v507_v43, %v487_v19 }
 0x11c   :  { %v560_v51 = vadd.f32 %v544_v10, %v524_v37  ;;  %v114_v9 = vpop.permute.xlu1 %113  ;;  %v408_v3 = vpop.permute.xlu0 %407 }
 0x11e   :  { %v576_v6 = vmax.f32 %v560_v51, 0.0 }
 0x120   :  { %v611_v55 = vand.u32 4294901760, %v576_v6 }
 0x121   :  { %v272_v41 = vpop.permute.xlu1 %271 }
 0x122   :  { %v2272_v46 = vsub.f32 %v576_v6, %v611_v55 }
 0x124   :  { %v740_v40 = vand.u32 4294901760, %v2272_v46 }
 0x126   :  { %v388_v38 = vpop.permute.xlu1 %387  ;;  %v741_v4 = vsub.f32 %v2272_v46, %v740_v40 }
 0x127   :  { %v543_v35 = vmul.f32 %v2088_v25, %v388_v38  ;;  %v545_v38 = vmul.f32 %v2088_v25, %v396_v58 }
 0x128   :  { %v742_v30 = vand.u32 4294901760, %v741_v4 }
 0x129   :  { %v559_v10 = vadd.f32 %v543_v35, %v523_v36  ;;  %v561_v36 = vadd.f32 %v545_v38, %v525_v21 }
 0x12b   :  { %v575_v16 = vmax.f32 %v559_v10, 0.0  ;;  %v2276_v13 = vpop.permute.xlu1 %208  ;;  %v136_v10 = vld [vmem:[#allocation2] sm:$0x1] }
 0x12c   :  { %139 = vperm.xlu0 %1766, %v136_v10  }
 0x12d   :  { %v608_v27 = vand.u32 4294901760, %v575_v16 }
 0x12f   :  { %v2279_v23 = vsub.f32 %v575_v16, %v608_v27  ;;  %v214_v48 = vpop.permute.xlu1 %213  ;;  %v2281_v42 = vpack.c.bf16 %v611_v55, %v608_v27  ;;  %v438_v16 = vmul.f32 %v2069_v7, %v2041_v57  ;;  %v577_v27 = vmax.f32 %v561_v36, 0.0 }
 0x130   :  { %1767 = vset.pattern.permute.xlu0 %v1797_v17 }
 0x131   :  { %v733_v24 = vand.u32 4294901760, %v2279_v23  ;;  %1574 = vmatpush3.bf16.msra.mxu1 %v2281_v42  ;;  %1646 = vmatpush3.bf16.msra.mxu0 %v2281_v42  ;;  %v454_v37 = vadd.f32 %v438_v16, %v114_v9 }
 0x132   :  { %1575 = vmatprep.subr.bf16.mxu1 %v1798_v29  ;;  %1647 = vmatprep.subr.bf16.mxu0 %v1798_v29 }
 0x133   :  { %v734_v51 = vsub.f32 %v2279_v23, %v733_v24  ;;  %v2292_v6 = vpack.c.bf16 %v740_v40, %v733_v24  ;;  %v474_v40 = vmul.f32 %v2081_v15, %v272_v41 }
 0x134   :  { %v336_v55 = vpop.permute.xlu1 %335 }
 0x135   :  { %v735_v50 = vand.u32 4294901760, %v734_v51  ;;  %v510_v4 = vmul.f32 %v2084_v18, %v336_v55  ;;  %v614_v51 = vand.u32 4294901760, %v577_v27 }
 0x137   :  { %v2294_v43 = vpack.c.bf16 %v742_v30, %v735_v50  ;;  %v490_v50 = vadd.f32 %v474_v40, %v454_v37  ;;  %v2303_v38 = vsub.f32 %v577_v27, %v614_v51 }
 0x139   :  { %v119_v19 = vpop.permute.xlu1 %118  ;;  %v526_v58 = vadd.f32 %v510_v4, %v490_v50  ;;  %v747_v36 = vand.u32 4294901760, %v2303_v38  ;;  %v440_v50 = vmul.f32 %v2069_v7, %v214_v48 }
 0x13b   :  { %v748_v17 = vsub.f32 %v2303_v38, %v747_v36 }
 0x13d   :  { %v749_v4 = vand.u32 4294901760, %v748_v17  ;;  %v548_v17 = vmul.f32 %v2088_v25, %v408_v3  ;;  %v477_v3 = vmul.f32 %v2081_v15, %v2120_v33  ;;  %v442_v33 = vmul.f32 %v2069_v7, %v2062_v5 }
 0x13e   :  { %v276_v35 = vpop.permute.xlu1 %275 }
 0x142   :  { %v280_v24 = vpop.permute.xlu1 %279 }
 0x147   :  { %v400_v30 = vpop.permute.xlu1 %399 }
 0x148   :  { %v546_v21 = vmul.f32 %v2088_v25, %v400_v30 }
 0x14a   :  { %v562_v10 = vadd.f32 %v546_v21, %v526_v58  ;;  %v476_v58 = vmul.f32 %v2081_v15, %v280_v24 }
 0x14c   :  { %v578_v60 = vmax.f32 %v562_v10, 0.0  ;;  %v219_v57 = vpop.permute.xlu1 %218  ;;  %v456_v10 = vadd.f32 %v440_v50, %v2055_v0 }
 0x14d   :  { %v441_v24 = vmul.f32 %v2069_v7, %v219_v57 }
 0x14e   :  { %v617_v41 = vand.u32 4294901760, %v578_v60  ;;  %v492_v16 = vadd.f32 %v476_v58, %v456_v10 }
 0x150   :  { %v2306_v59 = vsub.f32 %v578_v60, %v617_v41  ;;  %v2308_v9 = vpack.c.bf16 %v617_v41, %v614_v51 }
 0x151   :  { %v340_v55 = vpop.permute.xlu1 %339 }
 0x152   :  { %v754_v37 = vand.u32 4294901760, %v2306_v59  ;;  %1577 = vmatpush3.bf16.msra.mxu1 %v2308_v9  ;;  %1649 = vmatpush3.bf16.msra.mxu0 %v2308_v9 }
 0x153   :  { %1578 = vmatprep.subr.bf16.mxu1 %v1798_v29  ;;  %1650 = vmatprep.subr.bf16.mxu0 %v1798_v29 }
 0x154   :  { %v755_v60 = vsub.f32 %v2306_v59, %v754_v37  ;;  %v2319_v27 = vpack.c.bf16 %v754_v37, %v747_v36  ;;  %v439_v36 = vmul.f32 %v2069_v7, %v2276_v13  ;;  %v475_v37 = vmul.f32 %v2081_v15, %v276_v35 }
 0x155   :  { %v344_v40 = vpop.permute.xlu1 %343  ;;  %v457_v13 = vadd.f32 %v441_v24, %v2074_v11 }
 0x156   :  { %v756_v51 = vand.u32 4294901760, %v755_v60  ;;  %v512_v41 = vmul.f32 %v2084_v18, %v344_v40 }
 0x158   :  { %v2322_v30 = vpack.c.bf16 %v756_v51, %v749_v4  ;;  %v528_v60 = vadd.f32 %v512_v41, %v492_v16  ;;  %v455_v4 = vadd.f32 %v439_v36, %v119_v19  ;;  %v511_v51 = vmul.f32 %v2084_v18, %v340_v55  ;;  %v412_v19 = vpop.permute.xlu0 %411  ;;  %v39_v16 = vld [vmem:[%s2492_s3] sm:$0x1]  ;;  %s1802_s3 = smov [#allocation3]  }
 0x159   :  { %s1240_s7 = sshll.u32 %s1802_s3, 4  ;;  %s1241_s7 = int_to_ptr.vmem [resolvable:$true] %s1240_s7 }
 0x15a   :  { %v134_v21 = vpop.permute.xlu1 %133  ;;  %v491_v31 = vadd.f32 %v475_v37, %v455_v4  ;;  %v2333_v0 = vadd.f32 %v548_v17, %v528_v60  ;;  %v549_v37 = vmul.f32 %v2088_v25, %v412_v19  ;;  %v2350_v60 = vand.u32 4294901760, %v39_v16  ;;  %s1770_s8 = scalar_lea.vmem %s1241_s7, 32  ;;  %p1775_p1 = scmp.lt.s32.totalorder %s1241_s7, %s1241_s7 }
 0x15b   :  { %p1771_p0 = scmp.ne.s32.totalorder %s1241_s7, %s1770_s8  ;;  %p1776_p2 = scmp.lt.s32.totalorder %s1770_s8, %s1770_s8 }
 0x15c   :  { %v527_v50 = vadd.f32 %v511_v51, %v491_v31  ;;  %v580_v35 = vmax.f32 %v2333_v0, 0.0  ;;  %v493_v31 = vadd.f32 %v477_v3, %v457_v13  ;;  %v2363_v5 = vsub.f32 %v39_v16, %v2350_v60 }
 0x15d   :  { %p1777_p3 = por %p1776_p2, %p1775_p1 }
 0x15e   :  { %v623_v11 = vand.u32 4294901760, %v580_v35 }
 0x15f   :  { %v288_v48 = vpop.permute.xlu1 %287  ;;  %p1778_p4 = pnand %p1777_p3, %p1771_p0 }
 0x160   :  { %v478_v4 = vmul.f32 %v2081_v15, %v288_v48 }
 0x164   :  { %v404_v40 = vpop.permute.xlu1 %403 }
 0x165   :  { %v547_v58 = vmul.f32 %v2088_v25, %v404_v40 }
 0x167   :  { %v2338_v10 = vadd.f32 %v547_v58, %v527_v50  ;;  %v458_v50 = vadd.f32 %v442_v33, %v134_v21 }
 0x169   :  { %v579_v55 = vmax.f32 %v2338_v10, 0.0  ;;  %v348_v57 = vpop.permute.xlu1 %347  ;;  %v494_v7 = vadd.f32 %v478_v4, %v458_v50 }
 0x16a   :  { %v513_v41 = vmul.f32 %v2084_v18, %v348_v57 }
 0x16b   :  { %v620_v36 = vand.u32 4294901760, %v579_v55 }
 0x16c   :  { %v529_v17 = vadd.f32 %v513_v41, %v493_v31 }
 0x16d   :  { %v352_v51 = vpop.permute.xlu1 %351  ;;  %v2355_v24 = vpack.c.bf16 %v623_v11, %v620_v36 }
 0x16e   :  { %v565_v40 = vadd.f32 %v549_v37, %v529_v17  ;;  %v514_v58 = vmul.f32 %v2084_v18, %v352_v51  ;;  %v666_v18 = vand.u32 4294901760, %v2363_v5 }
 0x16f   :  { %1580 = vmatpush3.bf16.msra.mxu1 %v2355_v24  ;;  %1652 = vmatpush3.bf16.msra.mxu0 %v2355_v24 }
 0x170   :  { %v581_v13 = vmax.f32 %v565_v40, 0.0  ;;  %1581 = vmatprep.subr.bf16.mxu1 %v1798_v29  ;;  %1653 = vmatprep.subr.bf16.mxu0 %v1798_v29  ;;  %v530_v10 = vadd.f32 %v514_v58, %v494_v7  ;;  %v667_v31 = vsub.f32 %v2363_v5, %v666_v18 }
 0x172   :  { %v416_v15 = vpop.permute.xlu1 %415  ;;  %v626_v48 = vand.u32 4294901760, %v581_v13  ;;  %v668_v33 = vand.u32 4294901760, %v667_v31 }
 0x173   :  { %v550_v21 = vmul.f32 %v2088_v25, %v416_v15 }
 0x174   :  { %v2367_v19 = vsub.f32 %v581_v13, %v626_v48 }
 0x175   :  { %v566_v3 = vadd.f32 %v550_v21, %v530_v10 }
 0x176   :  { %v775_v37 = vand.u32 4294901760, %v2367_v19 }
 0x177   :  { %v582_v57 = vmax.f32 %v566_v3, 0.0 }
 0x178   :  { %v776_v25 = vsub.f32 %v2367_v19, %v775_v37 }
 0x179   :  { %v629_v41 = vand.u32 4294901760, %v582_v57 }
 0x17a   :  { %v777_v58 = vand.u32 4294901760, %v776_v25 }
 0x17b   :  { %v2371_v17 = vsub.f32 %v582_v57, %v629_v41  ;;  %v2373_v16 = vpack.c.bf16 %v629_v41, %v626_v48 }
 0x17d   :  { %v782_v4 = vand.u32 4294901760, %v2371_v17  ;;  %1583 = vmatpush3.bf16.msra.mxu1 %v2373_v16  ;;  %1655 = vmatpush3.bf16.msra.mxu0 %v2373_v16  ;;  %v1630_v51 = vpack.c.bf16 %v2371_v17, %v2367_v19 }
 0x17e   :  { %1584 = vmatprep.subr.bf16.mxu1 %v1798_v29  ;;  %1656 = vmatprep.subr.bf16.mxu0 %v1798_v29 }
 0x17f   :  { %v783_v40 = vsub.f32 %v2371_v17, %v782_v4  ;;  %v1678_v50 = vpack.c.bf16 %v782_v4, %v775_v37 }
 0x180   :  { %1383 = vmatmul.mubr.f32.vlgmr.msra.gmra.mrb[0].mxu1 %v668_v33  ;;  %1488 = vmatmul.mubr.f32.vlgmr.msra.gmra.mrb[0].mxu0 %v666_v18 }
 0x181   :  { %1586 = vmatpush3.bf16.msra.mxu1 %v2200_v14  ;;  %1658 = vmatpush3.bf16.msra.mxu0 %v2184_v47  ;;  %v784_v13 = vand.u32 4294901760, %v783_v40  ;;  %v2396_v47 = vsub.f32 %v579_v55, %v620_v36  ;;  %v767_v14 = vsub.f32 %v580_v35, %v623_v11 }
 0x182   :  { %1587 = vmatprep.subr.bf16.mxu1 %v1798_v29  ;;  %1659 = vmatprep.subr.bf16.mxu0 %v1798_v29 }
 0x183   :  { %v1606_v7 = vpack.c.bf16 %v784_v13, %v777_v58  ;;  %1417 = vmatprep.mubr.msk.f32.mxu1 %vm1799_vm0, %v1800_v62  ;;  %1522 = vmatprep.mubr.msk.f32.mxu0 %vm1799_vm0, %v1800_v62 }
 0x185   :  { %1589 = vmatpush3.bf16.msra.mxu1 %v2208_v12  ;;  %1661 = vmatpush3.bf16.msra.mxu0 %v2202_v49  ;;  %v761_v12 = vand.u32 4294901760, %v2396_v47  ;;  %v768_v49 = vand.u32 4294901760, %v767_v14 }
 0x186   :  { %1590 = vmatprep.subr.bf16.mxu1 %v1798_v29  ;;  %1662 = vmatprep.subr.bf16.mxu0 %v1798_v29 }
 0x187   :  { %v762_v0 = vsub.f32 %v2396_v47, %v761_v12  ;;  %v1675_v35 = vpack.c.bf16 %v768_v49, %v761_v12 }
 0x189   :  { %1592 = vmatpush3.bf16.msra.mxu1 %v2227_v44  ;;  %1664 = vmatpush3.bf16.msra.mxu0 %v2225_v61  ;;  %v769_v61 = vsub.f32 %v767_v14, %v768_v49  ;;  %v763_v44 = vand.u32 4294901760, %v762_v0 }
 0x18a   :  { %1593 = vmatprep.subr.bf16.mxu1 %v1798_v29  ;;  %1665 = vmatprep.subr.bf16.mxu0 %v1798_v29 }
 0x18d   :  { %1595 = vmatpush3.bf16.msra.mxu1 %v2267_v45  ;;  %1667 = vmatpush3.bf16.msra.mxu0 %v2263_v8  ;;  %v770_v8 = vand.u32 4294901760, %v769_v61 }
 0x18e   :  { %1596 = vmatprep.subr.bf16.mxu1 %v1798_v29  ;;  %1668 = vmatprep.subr.bf16.mxu0 %v1798_v29 }
 0x18f   :  { %v1603_v45 = vpack.c.bf16 %v770_v8, %v763_v44 }
 0x191   :  { %1598 = vmatpush3.bf16.msra.mxu1 %v2294_v43  ;;  %1670 = vmatpush3.bf16.msra.mxu0 %v2292_v6  ;;  %v2495_v6 = vpack.c.bf16 %v2158_v52, %v2113_v26  ;;  %v2496_v43 = vpack.c.bf16 %v2116_v28, %v2174_v54  ;;  %v2497_v26 = vpack.c.bf16 %v2194_v22, %v2210_v34 }
 0x192   :  { %1599 = vmatprep.subr.bf16.mxu1 %v1798_v29  ;;  %1671 = vmatprep.subr.bf16.mxu0 %v1798_v29  ;;  %v2498_v28 = vpack.c.bf16 %v2246_v39, %v2206_v56  ;;  %v2499_v52 = vpack.c.bf16 %v2272_v46, %v2279_v23  ;;  %v1627_v54 = vpack.c.bf16 %v767_v14, %v2396_v47  ;;  %v1801_v23 = vmov -1.0  }
 0x195   :  { %1601 = vmatpush3.bf16.msra.mxu1 %v2322_v30  ;;  %1673 = vmatpush3.bf16.msra.mxu0 %v2319_v27 }
 0x196   :  { %1602 = vmatprep.subr.bf16.mxu1 %v1798_v29  ;;  %1674 = vmatprep.subr.bf16.mxu0 %v1798_v29 }
 0x199   :  { %1604 = vmatpush3.bf16.msra.mxu1 %v1603_v45  ;;  %1676 = vmatpush3.bf16.msra.mxu0 %v1675_v35 }
 0x19a   :  { %1605 = vmatprep.subr.bf16.mxu1 %v1798_v29  ;;  %1677 = vmatprep.subr.bf16.mxu0 %v1798_v29 }
 0x19d   :  { %1607 = vmatpush3.bf16.msra.mxu1 %v1606_v7  ;;  %1679 = vmatpush3.bf16.msra.mxu0 %v1678_v50 }
 0x19e   :  { %1608 = vmatprep.subr.bf16.mxu1 %v1798_v29  ;;  %1680 = vmatprep.subr.bf16.mxu0 %v1798_v29 }
 0x1a0   :  { %1418 = vmatmul.mubr.f32.vlgmr.msra.gmra.mrb[0].mxu1 %v2350_v60  ;;  %1523 = vmatmul.mubr.f32.vlgmr.msra.gmra.mrb[0].mxu0 %v2350_v60 }
 0x1a1   :  { %1610 = vmatpush3.bf16.msra.mxu1 %v2495_v6  ;;  %1682 = vmatpush3.bf16.msra.mxu0 %v2164_v2  ;;  %v2500_v2 = vpack.c.bf16 %v2306_v59, %v2303_v38 }
 0x1a2   :  { %1611 = vmatprep.subr.bf16.mxu1 %v1798_v29  ;;  %1683 = vmatprep.subr.bf16.mxu0 %v1798_v29 }
 0x1a3   :  { %1452 = vmatprep.mubr.msk.f32.mxu1 %vm1799_vm0, %v1800_v62  ;;  %1557 = vmatprep.mubr.msk.f32.mxu0 %vm1799_vm0, %v1800_v62 }
 0x1a5   :  { %1613 = vmatpush3.bf16.msra.mxu1 %v2496_v43  ;;  %1685 = vmatpush3.bf16.msra.mxu0 %v2182_v20 }
 0x1a6   :  { %1614 = vmatprep.subr.bf16.mxu1 %v1798_v29  ;;  %1686 = vmatprep.subr.bf16.mxu0 %v1798_v29 }
 0x1a9   :  { %1616 = vmatpush3.bf16.msra.mxu1 %v2497_v26  ;;  %1688 = vmatpush3.bf16.msra.mxu0 %v2212_v32 }
 0x1aa   :  { %1617 = vmatprep.subr.bf16.mxu1 %v1798_v29  ;;  %1689 = vmatprep.subr.bf16.mxu0 %v1798_v29 }
 0x1ab   :  { %v140_v20 = vpop.permute.xlu0 %139 }
 0x1ac   :  { %v145_v22 = vrot.slane %v140_v20, %v2058_v1 }
 0x1ad   :  { %1619 = vmatpush3.bf16.msra.mxu1 %v2498_v28  ;;  %1691 = vmatpush3.bf16.msra.mxu0 %v2248_v53 }
 0x1ae   :  { %1620 = vmatprep.subr.bf16.mxu1 %v1798_v29  ;;  %1692 = vmatprep.subr.bf16.mxu0 %v1798_v29 }
 0x1b1   :  { %1622 = vmatpush3.bf16.msra.mxu1 %v2499_v52  ;;  %1694 = vmatpush3.bf16.msra.mxu0 %v2281_v42  ;;  %v421_v42 = vsel %vm420_vm1, 1.0, %v1801_v23 }
 0x1b2   :  { %1623 = vmatprep.subr.bf16.mxu1 %v1798_v29  ;;  %1695 = vmatprep.subr.bf16.mxu0 %v1798_v29 }
 0x1b5   :  { %1625 = vmatpush3.bf16.msra.mxu1 %v2500_v2  ;;  %1697 = vmatpush3.bf16.msra.mxu0 %v2308_v9 }
 0x1b6   :  { %1626 = vmatprep.subr.bf16.mxu1 %v1798_v29  ;;  %1698 = vmatprep.subr.bf16.mxu0 %v1798_v29 }
 0x1b9   :  { %1628 = vmatpush3.bf16.msra.mxu1 %v1627_v54  ;;  %1700 = vmatpush3.bf16.msra.mxu0 %v2355_v24 }
 0x1ba   :  { %1629 = vmatprep.subr.bf16.mxu1 %v1798_v29  ;;  %1701 = vmatprep.subr.bf16.mxu0 %v1798_v29 }
 0x1bd   :  { %1631 = vmatpush3.bf16.msra.mxu1 %v1630_v51  ;;  %1703 = vmatpush3.bf16.msra.mxu0 %v2373_v16 }
 0x1c0   :  { %1453 = vmatmul.mubr.f32.vlgmr.msra.gmra.mrb[0].mxu1 %v2363_v5  ;;  %1558 = vmatmul.mubr.f32.vlgmr.msra.gmra.mrb[0].mxu0 %v2350_v60 }
 0x293   :  { %v925_v56 = vpop.f32.mrb[0].mxu1  ;;  %v1220_v34 = vpop.f32.mrb[0].mxu0 }
 0x294   :  { %v1704_v32 = vadd.f32 %v925_v56, %v145_v22  ;;  %v1454_v59 = vpop.f32.mrb[1].mxu1  ;;  %v1559_v62 = vpop.f32.mrb[1].mxu0 }
 0x296   :  { %v1705_v39 = vadd.f32 %v1704_v32, %v1220_v34 }
 0x298   :  { %v1224_v29 = vmul.f32 0.5, %v1705_v39 }
 0x29a   :  { %1768 = vtanh.f32 %v1224_v29 }
 0x2a4   :  { %v1769_v53 = vpop.eup %1768 }
 0x2a5   :  { %v1226_v46 = vmul.f32 0.5, %v1769_v53 }
 0x2a7   :  { %v1230_v38 = vrot.slane %v1226_v46, %v2058_v1 }
 0x2a9   :  { %v1231_v9 = vmul.f32 %v1230_v38, %v421_v42 }
 0x2ab   :  { %v1232_v27 = vadd.f32 0.5, %v1231_v9 }
 0x2ad   :  { %1233 = vst [vmem:[#allocation3] sm:$0x3] %v1232_v27 }
 0x2ae   :  { %1781 = shalt.err (!%p1778_p4)
}
 0x2af   :  { %s1782_s11 = scalar_lea.hbm %s2494_s5, 32 }
 0x2b0   :  { %p1783_p5 = scmp.ne.s32.totalorder %s2494_s5, %s1782_s11  ;;  %p1786_p6 = scmp.lt.u32.totalorder %s1782_s11, %s2494_s5 }
 0x2b2   :  { %p1788_p7 = pnand %p1786_p6, %p1783_p5 }
 0x2b4   :  { %1791 = shalt.err (!%p1788_p7)
}
 0x2b5   :  { %1243 = dma.vmem_to_hbm [thread:$0]  %s1241_s7, 32, %s2494_s5, [#allocation4]  }
 0x2b6   :  { %1792 = dma.done.wait [#allocation4], 32  }
 0x2b7   :  { %1793 = vsyncadd [#allocation4], 4294967264 }
 0x2b8   :  { %1247 = vsyncpa [#allocation4], 1 }

</bundles_post_ra>
